<compile_context>
chip_gen: v6e
topology: v6e:2x2x1
jax: 0.10.0
libtpu: 0.0.40
codegen_flags: <defaults>
</compile_context>

<pallas_src>
import jax
import jax.numpy as jnp
from jax.experimental import pallas as pl
from jax.experimental.pallas import tpu as pltpu


def _round_up(x, m):
    return (x + m - 1) // m * m


def _vmem_capacity_bytes():
    """Physical VMEM of the current TPU generation (conservative fallback)."""
    try:
        info = pltpu.get_tpu_info()
        for name in ("vmem_capacity_bytes", "vmem_size_bytes", "vmem_bytes"):
            cap = getattr(info, name, None)
            if cap:
                return int(cap)
    except Exception:
        pass
    return 64 << 20  # v7x per-core VMEM; safe lower bound for v5e/v6e too.


def _pick_reduction_tile(d_pad, target):
    """Largest multiple of 128 that divides d_pad and is <= target."""
    target = max(128, min(target, d_pad))
    best, t = 128, 128
    while t <= target:
        if d_pad % t == 0:
            best = t
        t += 128
    return best


# ----------------------------------------------------------------------------
# Kernels
# ----------------------------------------------------------------------------
def _mlp_resident_kernel(x_ref, w1_ref, b1_ref, w2_ref, b2_ref, scores_ref):
    """Fused MLP forward with all weights resident in VMEM.

    1-D grid over batch tiles.  x arrives as f32 and is cast to bf16 in-kernel
    just before the MXU dot; both matmuls accumulate in f32.
    """
    x_bf = x_ref[...].astype(jnp.bfloat16)
    h = jnp.dot(x_bf, w1_ref[...], preferred_element_type=jnp.float32)
    h = jnp.maximum(h + b1_ref[...].astype(jnp.float32), 0.0)
    s = jnp.dot(h.astype(jnp.bfloat16), w2_ref[...],
                preferred_element_type=jnp.float32)
    scores_ref[...] = (s + b2_ref[...].astype(jnp.float32)).astype(scores_ref.dtype)


def _mlp_streamed_kernel(x_ref, w1_ref, b1_ref, w2_ref, b2_ref, scores_ref,
                         h_acc_ref):
    """Fused MLP forward with W1 streamed over a reduction grid axis.

    Grid = (batch tiles [parallel], D tiles [arbitrary]).  The hidden
    pre-activation is accumulated in an f32 VMEM scratch using a
    write-on-first-step pattern (no zero-init pass); the epilogue (bias, ReLU,
    second matmul, bias, store) runs on the last k step.  W2 / biases are
    whole-array VMEM residents.
    """
    k = pl.program_id(1)
    partial = jnp.dot(x_ref[...].astype(jnp.bfloat16), w1_ref[...],
                      preferred_element_type=jnp.float32)

    @pl.when(k == 0)
    def _():
        h_acc_ref[...] = partial

    @pl.when(k > 0)
    def _():
        h_acc_ref[...] += partial

    @pl.when(k == pl.num_programs(1) - 1)
    def _():
        h = jnp.maximum(h_acc_ref[...] + b1_ref[...].astype(jnp.float32), 0.0)
        s = jnp.dot(h.astype(jnp.bfloat16), w2_ref[...],
                    preferred_element_type=jnp.float32)
        scores_ref[...] = (s + b2_ref[...].astype(jnp.float32)).astype(
            scores_ref.dtype)


# ----------------------------------------------------------------------------
# Wrappers
# ----------------------------------------------------------------------------
def prepare_solver_params(w1, b1, w2, b2):
    """One-time weight padding/casting to MXU-friendly bf16 layouts.

    Call once per parameter set; the result is reused across solve() calls so
    the per-call path never re-pads / re-casts / re-writes the weights to HBM.
    Zero-padded W1/b1 columns give hidden = relu(0) = 0; zero-padded W2
    rows/columns then contribute nothing to the real class scores.
    """
    d, hidden = w1.shape
    num_classes = w2.shape[1]
    h_pad = _round_up(hidden, 128)
    c_pad = _round_up(num_classes, 128)
    d_pad = d if d % 128 == 0 else _round_up(d, 128)

    bf = jnp.bfloat16
    b1 = jnp.asarray(b1).reshape(1, hidden)
    b2 = jnp.asarray(b2).reshape(1, num_classes)
    w1b = jnp.zeros((d_pad, h_pad), bf).at[:d, :hidden].set(w1.astype(bf))
    b1b = jnp.zeros((1, h_pad), bf).at[:, :hidden].set(b1.astype(bf))
    w2b = jnp.zeros((h_pad, c_pad), bf).at[:hidden, :num_classes].set(w2.astype(bf))
    b2b = jnp.zeros((1, c_pad), bf).at[:, :num_classes].set(b2.astype(bf))
    return dict(w1=w1b, b1=b1b, w2=w2b, b2=b2b,
                d=d, hidden=hidden, num_classes=num_classes)


def solver_solve(x_nchw, params, *, tile_n=512, tile_d=1024,
                 force_streamed=False):
    """Flatten NCHW -> (N, D), run the fused Pallas MLP, return (scores, preds)."""
    n = x_nchw.shape[0]
    x2d = x_nchw.reshape(n, -1)  # row-major flatten, same as torch .view(N, -1)
    assert x2d.shape[1] == params["d"], "feature dim mismatch with prepared params"

    d = params["d"]
    num_classes = params["num_classes"]
    w1b, b1b, w2b, b2b = params["w1"], params["b1"], params["w2"], params["b2"]
    d_pad, h_pad = w1b.shape
    c_pad = w2b.shape[1]

    # Activations stay f32; the bf16 cast happens inside the kernel right
    # before the MXU dot (no extra HBM pad/cast pass over x).  Only pad the
    # feature dim in the rare case D is not a multiple of 128.
    if d_pad != d:
        x2d = jnp.pad(x2d, ((0, 0), (0, d_pad - d)))

    # Batch tile: multiple of 16 (native bf16 sublane packing).  Tiny batches
    # run as a single exact full-array block (no padding, no masked rows).
    if n >= 16:
        tile_n = max(16, min(_round_up(tile_n, 16), _round_up(n, 16)))
        # v7x has 2 TensorCores: keep >= 2 programs on the 'parallel' batch
        # axis whenever the batch is large enough to split.
        while tile_n > 16 and pl.cdiv(n, tile_n) < 2:
            tile_n = max(16, _round_up(tile_n // 2, 16))
    else:
        tile_n = n

    vmem_budget = int(0.8 * _vmem_capacity_bytes())  # generation-aware cap

    resident_bytes = (
        d_pad * h_pad * 2              # W1 bf16, whole-array resident (1 buffer)
        + h_pad * c_pad * 2            # W2 bf16, resident
        + (h_pad + c_pad) * 2          # biases, resident
        + 2 * tile_n * d_pad * 4       # x blocks, f32, double-buffered
        + 2 * tile_n * c_pad * 4       # scores blocks, f32, double-buffered
    )
    use_resident = (not force_streamed) and resident_bytes <= vmem_budget

    if use_resident:
        grid = (pl.cdiv(n, tile_n),)
        scores_full = pl.pallas_call(
            _mlp_resident_kernel,
            out_shape=jax.ShapeDtypeStruct((n, c_pad), jnp.float32),
            grid_spec=pltpu.PrefetchScalarGridSpec(
                num_scalar_prefetch=0,
                grid=grid,
                in_specs=[
                    pl.BlockSpec((tile_n, d_pad), lambda i: (i, 0)),      # x (f32)
                    pl.BlockSpec(memory_space=pltpu.MemorySpace.VMEM),    # W1 resident
                    pl.BlockSpec(memory_space=pltpu.MemorySpace.VMEM),    # b1 resident
                    pl.BlockSpec(memory_space=pltpu.MemorySpace.VMEM),    # W2 resident
                    pl.BlockSpec(memory_space=pltpu.MemorySpace.VMEM),    # b2 resident
                ],
                out_specs=pl.BlockSpec((tile_n, c_pad), lambda i: (i, 0)),
            ),
            compiler_params=pltpu.CompilerParams(
                dimension_semantics=("parallel",),
                vmem_limit_bytes=vmem_budget,
            ),
        )(x2d, w1b, b1b, w2b, b2b)
    else:
        # Streamed-W1 fallback for very large D.
        tile_d = _pick_reduction_tile(d_pad, tile_d)

        def streamed_vmem(tn, td):
            return (2 * tn * td * 4                               # x blocks (f32)
                    + 2 * td * h_pad * 2                          # W1 blocks (bf16)
                    + h_pad * c_pad * 2 + (h_pad + c_pad) * 2     # resident W2/biases
                    + 2 * tn * c_pad * 4                          # scores blocks
                    + tn * h_pad * 4)                             # f32 accumulator

        while streamed_vmem(tile_n, tile_d) > vmem_budget and tile_d > 128:
            tile_d = _pick_reduction_tile(d_pad, tile_d // 2)
        while streamed_vmem(tile_n, tile_d) > vmem_budget and tile_n > 16:
            tile_n = max(16, _round_up(tile_n // 2, 16))

        grid = (pl.cdiv(n, tile_n), d_pad // tile_d)
        scores_full = pl.pallas_call(
            _mlp_streamed_kernel,
            out_shape=jax.ShapeDtypeStruct((n, c_pad), jnp.float32),
            grid_spec=pltpu.PrefetchScalarGridSpec(
                num_scalar_prefetch=0,
                grid=grid,
                in_specs=[
                    pl.BlockSpec((tile_n, tile_d), lambda i, k: (i, k)),   # x (f32)
                    pl.BlockSpec((tile_d, h_pad), lambda i, k: (k, 0)),    # W1 streamed
                    pl.BlockSpec(memory_space=pltpu.MemorySpace.VMEM),     # b1 resident
                    pl.BlockSpec(memory_space=pltpu.MemorySpace.VMEM),     # W2 resident
                    pl.BlockSpec(memory_space=pltpu.MemorySpace.VMEM),     # b2 resident
                ],
                out_specs=pl.BlockSpec((tile_n, c_pad), lambda i, k: (i, 0)),
                scratch_shapes=[pltpu.VMEM((tile_n, h_pad), jnp.float32)],
            ),
            compiler_params=pltpu.CompilerParams(
                dimension_semantics=("parallel", "arbitrary"),
                vmem_limit_bytes=vmem_budget,
            ),
        )(x2d, w1b, b1b, w2b, b2b)

    scores = scores_full[:, :num_classes]
    # predictions = torch.max(scores, 1)[1]; argmax over <=128 classes is a
    # trivial follow-up XLA op and avoids a masked lane-1 store in the kernel.
    preds = jnp.argmax(scores, axis=1).astype(jnp.int32)
    return scores, preds


if __name__ == "__main__":
    # Small, deterministic example shapes consistent with the module:
    # batch=2, channels=4, spatial=16x16, hidden=32, num_classes=10.
    N, C, H, W = 2, 4, 16, 16
    D = C * H * W
    HIDDEN = 32
    NUM_CLASSES = 10

    key = jax.random.PRNGKey(0)
    kx, kw1, kb1, kw2, kb2 = jax.random.split(key, 5)

    x = jax.random.normal(kx, (N, C, H, W), dtype=jnp.float32)
    w1 = jax.random.normal(kw1, (D, HIDDEN), dtype=jnp.float32) * 0.02
    b1 = jax.random.normal(kb1, (1, HIDDEN), dtype=jnp.float32) * 0.01
    w2 = jax.random.normal(kw2, (HIDDEN, NUM_CLASSES), dtype=jnp.float32) * 0.02
    b2 = jax.random.normal(kb2, (1, NUM_CLASSES), dtype=jnp.float32) * 0.01

    params = prepare_solver_params(w1, b1, w2, b2)       # one-time weight prep

    scores, preds = solver_solve(x, params)              # resident-W1 fast path
    jax.block_until_ready((scores, preds))

    # Also exercise the streamed-W1 (large-D fallback) path at these shapes.
    scores_s, preds_s = solver_solve(x, params, tile_d=256, force_streamed=True)
    jax.block_until_ready((scores_s, preds_s))

    # Pure-JAX reference with the same bf16 rounding of inputs/weights/hidden
    # and f32 accumulation (matches the MXU bf16 x bf16 -> f32 path).
    rnd = lambda a: a.astype(jnp.bfloat16).astype(jnp.float32)
    x2d = rnd(x.reshape(N, -1))
    ref_h = jnp.maximum(x2d @ rnd(w1) + rnd(b1), 0.0)
    ref_scores = rnd(ref_h) @ rnd(w2) + rnd(b2)
    ref_preds = jnp.argmax(ref_scores, axis=1).astype(jnp.int32)

    assert scores.shape == (N, NUM_CLASSES)
    assert jnp.allclose(scores, ref_scores, atol=5e-3, rtol=5e-2), (
        jnp.max(jnp.abs(scores - ref_scores)))
    assert jnp.allclose(scores_s, ref_scores, atol=5e-3, rtol=5e-2), (
        jnp.max(jnp.abs(scores_s - ref_scores)))
    assert jnp.array_equal(preds, ref_preds)
    assert jnp.array_equal(preds_s, ref_preds)

    # TODO(synk): train_a_batch (loss/backward/optimizer step) is a training
    # loop, not a forward kernel; only forward + solve (argmax) is implemented.
    print("KERNEL_OK")
</pallas_src>

<mosaic_0001>
module attributes {stable_mosaic.version = 11 : i64} {
  func.func @_mlp_resident_kernel(%arg0: i32, %arg1: memref<2x1024xf32, #tpu.memory_space<vmem>>, %arg2: memref<1024x128xbf16, #tpu.memory_space<vmem>>, %arg3: memref<1x128xbf16, #tpu.memory_space<vmem>>, %arg4: memref<128x128xbf16, #tpu.memory_space<vmem>>, %arg5: memref<1x128xbf16, #tpu.memory_space<vmem>>, %arg6: memref<2x128xf32, #tpu.memory_space<vmem>>) attributes {dimension_semantics = [#tpu.dimension_semantics<parallel>], iteration_bounds = array<i64: 1>, scalar_prefetch = 0 : i64, scratch_operands = 0 : i64, tpu.core_type = #tpu.core_type<tc>, window_params = [{transform_indices = @transform_0, window_bounds = array<i64: 2, 1024>}, {pipeline_mode = #tpu.pipeline_mode<synchronous>, transform_indices = @transform_1, window_bounds = array<i64: 1024, 128>}, {pipeline_mode = #tpu.pipeline_mode<synchronous>, transform_indices = @transform_2, window_bounds = array<i64: 1, 128>}, {pipeline_mode = #tpu.pipeline_mode<synchronous>, transform_indices = @transform_3, window_bounds = array<i64: 128, 128>}, {pipeline_mode = #tpu.pipeline_mode<synchronous>, transform_indices = @transform_4, window_bounds = array<i64: 1, 128>}, {transform_indices = @transform_5, window_bounds = array<i64: 2, 128>}]} {
    %c0 = arith.constant 0 : index
    %c0_0 = arith.constant 0 : index
    %0 = vector.load %arg1[%c0, %c0_0] : memref<2x1024xf32, #tpu.memory_space<vmem>>, vector<2x1024xf32>
    %1 = arith.truncf %0 : vector<2x1024xf32> to vector<2x1024xbf16>
    %c0_1 = arith.constant 0 : index
    %c0_2 = arith.constant 0 : index
    %2 = vector.load %arg2[%c0_1, %c0_2] : memref<1024x128xbf16, #tpu.memory_space<vmem>>, vector<1024x128xbf16>
    %cst = arith.constant dense<0.000000e+00> : vector<2x128xf32>
    %3 = tpu.matmul %1, %2, %cst {dimension_numbers = #tpu.dot_dimension_numbers<[1], [0], [0], [1], [0, 0, 1, 1], [], []>} : vector<2x1024xbf16>, vector<1024x128xbf16>, vector<2x128xf32> -> vector<2x128xf32>
    %c0_3 = arith.constant 0 : index
    %c0_4 = arith.constant 0 : index
    %4 = vector.load %arg3[%c0_3, %c0_4] : memref<1x128xbf16, #tpu.memory_space<vmem>>, vector<1x128xbf16>
    %5 = arith.extf %4 : vector<1x128xbf16> to vector<1x128xf32>
    %6 = vector.broadcast %5 : vector<1x128xf32> to vector<2x128xf32>
    %7 = arith.addf %3, %6 : vector<2x128xf32>
    %cst_5 = arith.constant 0.000000e+00 : f32
    %8 = vector.broadcast %cst_5 : f32 to vector<2x128xf32>
    %9 = arith.maximumf %7, %8 : vector<2x128xf32>
    %10 = arith.truncf %9 : vector<2x128xf32> to vector<2x128xbf16>
    %c0_6 = arith.constant 0 : index
    %c0_7 = arith.constant 0 : index
    %11 = vector.load %arg4[%c0_6, %c0_7] : memref<128x128xbf16, #tpu.memory_space<vmem>>, vector<128x128xbf16>
    %cst_8 = arith.constant dense<0.000000e+00> : vector<2x128xf32>
    %12 = tpu.matmul %10, %11, %cst_8 {dimension_numbers = #tpu.dot_dimension_numbers<[1], [0], [0], [1], [0, 0, 1, 1], [], []>} : vector<2x128xbf16>, vector<128x128xbf16>, vector<2x128xf32> -> vector<2x128xf32>
    %c0_9 = arith.constant 0 : index
    %c0_10 = arith.constant 0 : index
    %13 = vector.load %arg5[%c0_9, %c0_10] : memref<1x128xbf16, #tpu.memory_space<vmem>>, vector<1x128xbf16>
    %14 = arith.extf %13 : vector<1x128xbf16> to vector<1x128xf32>
    %15 = vector.broadcast %14 : vector<1x128xf32> to vector<2x128xf32>
    %16 = arith.addf %12, %15 : vector<2x128xf32>
    %c0_11 = arith.constant 0 : index
    %c0_12 = arith.constant 0 : index
    %17 = vector.load %arg6[%c0_11, %c0_12] : memref<2x128xf32, #tpu.memory_space<vmem>>, vector<2x128xf32>
    tpu.vector_store %arg6[%c0_11, %c0_12], %16 {strides = array<i32>} : memref<2x128xf32, #tpu.memory_space<vmem>>, vector<2x128xf32>,
    return
  }
  func.func @transform_0(%arg0: i32) -> (i32, i32) {
    %c0_i32 = arith.constant 0 : i32
    %c0_i32_0 = arith.constant 0 : i32
    return %arg0, %c0_i32 : i32, i32
  }
  func.func @transform_1(%arg0: i32) -> (i32, i32) {
    %c0_i32 = arith.constant 0 : i32
    %c0_i32_0 = arith.constant 0 : i32
    %c0_i32_1 = arith.constant 0 : i32
    return %c0_i32, %c0_i32_0 : i32, i32
  }
  func.func @transform_2(%arg0: i32) -> (i32, i32) {
    %c0_i32 = arith.constant 0 : i32
    %c0_i32_0 = arith.constant 0 : i32
    %c0_i32_1 = arith.constant 0 : i32
    return %c0_i32, %c0_i32_0 : i32, i32
  }
  func.func @transform_3(%arg0: i32) -> (i32, i32) {
    %c0_i32 = arith.constant 0 : i32
    %c0_i32_0 = arith.constant 0 : i32
    %c0_i32_1 = arith.constant 0 : i32
    return %c0_i32, %c0_i32_0 : i32, i32
  }
  func.func @transform_4(%arg0: i32) -> (i32, i32) {
    %c0_i32 = arith.constant 0 : i32
    %c0_i32_0 = arith.constant 0 : i32
    %c0_i32_1 = arith.constant 0 : i32
    return %c0_i32, %c0_i32_0 : i32, i32
  }
  func.func @transform_5(%arg0: i32) -> (i32, i32) {
    %c0_i32 = arith.constant 0 : i32
    %c0_i32_0 = arith.constant 0 : i32
    return %arg0, %c0_i32 : i32, i32
  }
}

</mosaic_0001>

<bundles_post_ra>
// kernel: tpu_custom_call.1
= control target key start
LH: loop header
LB: loop body
LE: loop exit
PB: predicated region body
PF: predicated region fallthrough
CT: control target
= control target key end

     0   :  { %10 = vsyncpa [#allocation3], 0  ;;  %s1347_s0 = inlined_call_operand.hbm [shape: f32[2,1024], index: 0, kind: input, shape index: {}]   ;;  %s1348_s1 = inlined_call_operand.hbm [shape: bf16[1024,128], index: 1, kind: input, shape index: {}]   ;;  %s1349_s2 = inlined_call_operand.vmem [shape: bf16[1,128], index: 2, kind: input, shape index: {}]   ;;  %s1350_s3 = inlined_call_operand.hbm [shape: bf16[128,128], index: 3, kind: input, shape index: {}]   ;;  %s1351_s4 = inlined_call_operand.vmem [shape: bf16[1,128], index: 4, kind: input, shape index: {}]   ;;  %s1352_s5 = inlined_call_operand.hbm [shape: f32[2,128], index: 5, kind: output, shape index: {}]  }
   0x1   :  { %11 = vsyncpa [#allocation6], 0 }
   0x2   :  { %12 = vsyncpa [#allocation4], 0  ;;  %s1280_s18 = smov [#allocation5]  }
   0x3   :  { %s28_s19 = sshll.u32 %s1280_s18, 4  ;;  %s29_s19 = int_to_ptr.vmem [resolvable:$true] %s28_s19 }
   0x4   :  { %s1202_s20 = scalar_lea.vmem %s29_s19, 8192  ;;  %p1207_p1 = scmp.lt.s32.totalorder %s29_s19, %s29_s19 }
   0x5   :  { %p1203_p0 = scmp.ne.s32.totalorder %s29_s19, %s1202_s20  ;;  %p1208_p2 = scmp.lt.s32.totalorder %s1202_s20, %s1202_s20 }
   0x7   :  { %p1209_p3 = por %p1208_p2, %p1207_p1 }
   0x9   :  { %p1210_p4 = pnand %p1209_p3, %p1203_p0 }
   0xb   :  { %1213 = shalt.err (!%p1210_p4)
}
   0xc   :  { %s1281_s21 = smov 64   ;;  %s1282_s22 = smov 4  }
   0xd   :  { %34 = dma.hbm_to_vmem [thread:$0]  %s1348_s1, 8192, %s29_s19, [#allocation6], %s1281_s21, %s1281_s21, %s1282_s22  }
   0xe   :  { %s1283_s25 = smov [#allocation2]   ;;  %s1284_s27 = smov [#allocation7]  }
   0xf   :  { %s19_s26 = sshll.u32 %s1283_s25, 4  ;;  %s42_s28 = sshll.u32 %s1284_s27, 4  ;;  %s20_s26 = int_to_ptr.vmem [resolvable:$true] %s19_s26  ;;  %s43_s28 = int_to_ptr.vmem [resolvable:$true] %s42_s28 }
  0x10   :  { %s1222_s29 = scalar_lea.vmem %s20_s26, 256  ;;  %p1227_p6 = scmp.lt.s32.totalorder %s20_s26, %s20_s26 }
  0x11   :  { %p1223_p5 = scmp.ne.s32.totalorder %s20_s26, %s1222_s29  ;;  %p1228_p7 = scmp.lt.s32.totalorder %s1222_s29, %s1222_s29 }
  0x13   :  { %p1229_p8 = por %p1228_p7, %p1227_p6 }
  0x15   :  { %p1230_p9 = pnand %p1229_p8, %p1223_p5 }
  0x17   :  { %1233 = shalt.err (!%p1230_p9)
}
  0x18   :  { %22 = dma.hbm_to_vmem [thread:$0]  %s1347_s0, 256, %s20_s26, [#allocation3]  }
  0x19   :  { %s1242_s7 = scalar_lea.vmem %s43_s28, 1024  ;;  %p1247_p11 = scmp.lt.s32.totalorder %s43_s28, %s43_s28 }
  0x1a   :  { %p1243_p10 = scmp.ne.s32.totalorder %s43_s28, %s1242_s7  ;;  %p1248_p12 = scmp.lt.s32.totalorder %s1242_s7, %s1242_s7 }
  0x1c   :  { %p1249_p13 = por %p1248_p12, %p1247_p11 }
  0x1e   :  { %p1250_p0 = pnand %p1249_p13, %p1243_p10 }
  0x20   :  { %1253 = shalt.err (!%p1250_p0)
}
  0x21   :  { %48 = dma.hbm_to_vmem [thread:$0]  %s1350_s3, 1024, %s43_s28, [#allocation6], %s1281_s21, %s1281_s21, %s1282_s22  }
  0x22   :  { %1274 = dma.done.wait [#allocation3], 256  }
  0x23   :  { %1275 = vsyncadd [#allocation3], 4294967040 }
  0x24   :  { %1276 = dma.done.wait [#allocation6], 9216  }
  0x25   :  { %1277 = vsyncadd [#allocation6], 4294958080  ;;  %v1120_v0 = vld [vmem:[#allocation5 + $0x78] sm:$0xff]   ;;  %v1124_v4 = vld [vmem:[#allocation5 + $0x70] sm:$0xff]   ;;  %v1285_v22 = vmov 1983009808   ;;  %v69_v24 = vlaneseq }
  0x26   :  { %v1121_v1 = vld [vmem:[#allocation5 + $0xf8] sm:$0xff]   ;;  %994 = vmatprep.subr.bf16.mxu0 %v1120_v0  ;;  %v1125_v5 = vld [vmem:[#allocation5 + $0xf0] sm:$0xff]   ;;  %v1128_v8 = vld [vmem:[#allocation5 + $0x68] sm:$0xff]   ;;  %v67_v23 = vunpack.c.l.s4 %v1285_v22  ;;  %vm1287_vm0 = vmmov 0   ;;  %s1288_s10 = smov [#allocation8]  }
  0x27   :  { %v1122_v2 = vld [vmem:[#allocation5 + $0x38] sm:$0xff]   ;;  %1016 = vmatprep.subr.bf16.mxu1 %v1121_v1  ;;  %v1126_v6 = vld [vmem:[#allocation5 + $0x30] sm:$0xff]   ;;  %v1129_v9 = vld [vmem:[#allocation5 + $0xe8] sm:$0xff]   ;;  %v1328_v30 = vshrl.u32 %v69_v24, 7  ;;  %s912_s11 = sshll.u32 %s1288_s10, 4  ;;  %s913_s11 = int_to_ptr.vmem [resolvable:$true] %s912_s11 }
  0x28   :  { %v1123_v3 = vld [vmem:[#allocation5 + $0xb8] sm:$0xff]   ;;  %995 = vmatpush3.bf16.msra.mxu0 %v1122_v2  ;;  %v1127_v7 = vld [vmem:[#allocation5 + $0xb0] sm:$0xff]   ;;  %v1130_v10 = vld [vmem:[#allocation5 + $0x28] sm:$0xff]   ;;  %v68_v29 = vunpack.c.0.s8 %v67_v23  ;;  %s1254_s12 = scalar_lea.vmem %s913_s11, 32  ;;  %p1259_p2 = scmp.lt.s32.totalorder %s913_s11, %s913_s11 }
  0x29   :  { %1017 = vmatpush3.bf16.msra.mxu1 %v1123_v3  ;;  %996 = vmatprep.subr.bf16.mxu0 %v1124_v4  ;;  %v1131_v11 = vld [vmem:[#allocation5 + $0xa8] sm:$0xff]   ;;  %v1132_v12 = vld [vmem:[#allocation5 + $0x60] sm:$0xff]   ;;  %v1136_v16 = vld [vmem:[#allocation5 + $0x58] sm:$0xff]   ;;  %p1255_p1 = scmp.ne.s32.totalorder %s913_s11, %s1254_s12  ;;  %p1260_p3 = scmp.lt.s32.totalorder %s1254_s12, %s1254_s12 }
  0x2a   :  { %1018 = vmatprep.subr.bf16.mxu1 %v1125_v5  ;;  %v1133_v13 = vld [vmem:[#allocation5 + $0xe0] sm:$0xff]   ;;  %v1137_v17 = vld [vmem:[#allocation5 + $0xd8] sm:$0xff]   ;;  %v1140_v20 = vld [vmem:[#allocation5 + $0x50] sm:$0xff]   ;;  %v1331_v35 = vsub.s32 %v68_v29, %v1328_v30 }
  0x2b   :  { %v1134_v14 = vld [vmem:[#allocation5 + $0x20] sm:$0xff]   ;;  %v1138_v18 = vld [vmem:[#allocation5 + $0x18] sm:$0xff]   ;;  %v1141_v21 = vld [vmem:[#allocation5 + $0xd0] sm:$0xff]   ;;  %p1261_p4 = por %p1260_p3, %p1259_p2 }
  0x2c   :  { %997 = vmatpush3.bf16.msra.mxu0 %v1126_v6  ;;  %v1135_v15 = vld [vmem:[#allocation5 + $0xa0] sm:$0xff]   ;;  %v1139_v19 = vld [vmem:[#allocation5 + $0x98] sm:$0xff]   ;;  %v1142_v25 = vld [vmem:[#allocation5 + $0x10] sm:$0xff]  }
  0x2d   :  { %1019 = vmatpush3.bf16.msra.mxu1 %v1127_v7  ;;  %998 = vmatprep.subr.bf16.mxu0 %v1128_v8  ;;  %v1143_v26 = vld [vmem:[#allocation5 + $0x90] sm:$0xff]   ;;  %v1144_v27 = vld [vmem:[#allocation5 + $0x48] sm:$0xff]   ;;  %v1148_v33 = vld [vmem:[#allocation5 + $0x40] sm:$0xff]   ;;  %p1262_p5 = pnand %p1261_p4, %p1255_p1 }
  0x2e   :  { %1020 = vmatprep.subr.bf16.mxu1 %v1129_v9  ;;  %v1145_v28 = vld [vmem:[#allocation5 + $0xc8] sm:$0xff]   ;;  %v1149_v34 = vld [vmem:[#allocation5 + $0xc0] sm:$0xff]   ;;  %v61_v38 = vld [vmem:[#allocation2] sm:$0xff] }
  0x2f   :  { %v1146_v31 = vld [vmem:[#allocation5 + $0x8] sm:$0xff]   ;;  %v1150_v36 = vld [vmem:[#allocation5] sm:$0xff]   ;;  %v72_v39 = vrot.slane %v61_v38, %v1331_v35  ;;  %v65_v40 = vcombine.high %v61_v38, %v61_v38  ;;  %v1153_v41 = vld [vmem:[#allocation5 + $0x178] sm:$0xff]  }
  0x30   :  { %999 = vmatpush3.bf16.msra.mxu0 %v1130_v10  ;;  %v1147_v32 = vld [vmem:[#allocation5 + $0x88] sm:$0xff]   ;;  %v1151_v37 = vld [vmem:[#allocation5 + $0x80] sm:$0xff]   ;;  %v1154_v42 = vld [vmem:[#allocation5 + $0x1f8] sm:$0xff]  }
  0x31   :  { %1021 = vmatpush3.bf16.msra.mxu1 %v1131_v11  ;;  %1000 = vmatprep.subr.bf16.mxu0 %v1132_v12  ;;  %v80_v43 = vcombine.high %v72_v39, %v72_v39  ;;  %v79_v44 = vrot.slane %v65_v40, %v1331_v35  ;;  %v107_v45 = vpack.c.bf16 %v72_v39, %v72_v39  ;;  %v1155_v46 = vld [vmem:[#allocation5 + $0x138] sm:$0xff]   ;;  %v1157_v51 = vld [vmem:[#allocation5 + $0x170] sm:$0xff]   ;;  %v1161_v56 = vld [vmem:[#allocation5 + $0x168] sm:$0xff]  }
  0x32   :  { %1022 = vmatprep.subr.bf16.mxu1 %v1133_v13  ;;  %v1156_v49 = vld [vmem:[#allocation5 + $0x1b8] sm:$0xff]   ;;  %v1158_v53 = vld [vmem:[#allocation5 + $0x1f0] sm:$0xff]   ;;  %v1162_v57 = vld [vmem:[#allocation5 + $0x1e8] sm:$0xff]  }
  0x33   :  { %v108_v47 = vpack.c.bf16 %v80_v43, %v80_v43  ;;  %v81_v48 = vcombine.high %v79_v44, %v79_v44  ;;  %v109_v50 = vpack.c.bf16 %v79_v44, %v79_v44  ;;  %v1159_v54 = vld [vmem:[#allocation5 + $0x130] sm:$0xff]   ;;  %v1163_v58 = vld [vmem:[#allocation5 + $0x128] sm:$0xff]   ;;  %v1165_v60 = vld [vmem:[#allocation5 + $0x160] sm:$0xff]  }
  0x34   :  { %1001 = vmatpush3.bf16.msra.mxu0 %v1134_v14  ;;  %v1160_v55 = vld [vmem:[#allocation5 + $0x1b0] sm:$0xff]   ;;  %v1164_v59 = vld [vmem:[#allocation5 + $0x1a8] sm:$0xff]   ;;  %v1166_v61 = vld [vmem:[#allocation5 + $0x1e0] sm:$0xff]  }
  0x35   :  { %1023 = vmatpush3.bf16.msra.mxu1 %v1135_v15  ;;  %1002 = vmatprep.subr.bf16.mxu0 %v1136_v16  ;;  %v110_v52 = vpack.c.bf16 %v81_v48, %v81_v48  ;;  %v1167_v62 = vld [vmem:[#allocation5 + $0x120] sm:$0xff]   ;;  %v1169_v0 = vld [vmem:[#allocation5 + $0x158] sm:$0xff]   ;;  %v1173_v4 = vld [vmem:[#allocation5 + $0x150] sm:$0xff]  }
  0x36   :  { %1024 = vmatprep.subr.bf16.mxu1 %v1137_v17  ;;  %665 = vmatprep.mubr.bf16.mxu0 %v108_v47  ;;  %v1168_v63 = vld [vmem:[#allocation5 + $0x1a0] sm:$0xff]   ;;  %v1170_v1 = vld [vmem:[#allocation5 + $0x1d8] sm:$0xff]   ;;  %v1174_v5 = vld [vmem:[#allocation5 + $0x1d0] sm:$0xff]  }
  0x37   :  { %705 = vmatprep.mubr.bf16.mxu1 %v110_v52  ;;  %v1171_v2 = vld [vmem:[#allocation5 + $0x118] sm:$0xff]   ;;  %v1175_v6 = vld [vmem:[#allocation5 + $0x110] sm:$0xff]   ;;  %v1177_v8 = vld [vmem:[#allocation5 + $0x148] sm:$0xff]  }
  0x38   :  { %1003 = vmatpush3.bf16.msra.mxu0 %v1138_v18  ;;  %v1172_v3 = vld [vmem:[#allocation5 + $0x198] sm:$0xff]   ;;  %v1176_v7 = vld [vmem:[#allocation5 + $0x190] sm:$0xff]   ;;  %v1178_v9 = vld [vmem:[#allocation5 + $0x1c8] sm:$0xff]  }
  0x39   :  { %1025 = vmatpush3.bf16.msra.mxu1 %v1139_v19  ;;  %1004 = vmatprep.subr.bf16.mxu0 %v1140_v20  ;;  %v1179_v10 = vld [vmem:[#allocation5 + $0x108] sm:$0xff]   ;;  %v1181_v12 = vld [vmem:[#allocation5 + $0x140] sm:$0xff]   ;;  %v62_v15 = vld [vmem:[#allocation2 + $0x8] sm:$0xff] }
  0x3a   :  { %1026 = vmatprep.subr.bf16.mxu1 %v1141_v21  ;;  %v1180_v11 = vld [vmem:[#allocation5 + $0x188] sm:$0xff]   ;;  %v1182_v13 = vld [vmem:[#allocation5 + $0x1c0] sm:$0xff]   ;;  %v89_v17 = vrot.slane %v62_v15, %v1331_v35  ;;  %v82_v18 = vcombine.high %v62_v15, %v62_v15  ;;  %v243_v44 = vld [vmem:[%s1349_s2] sm:$0x1] }
  0x3b   :  { %v1183_v14 = vld [vmem:[#allocation5 + $0x100] sm:$0xff]   ;;  %v1188_v29 = vld [vmem:[#allocation7 + $0x28] sm:$0xff]  }
  0x3c   :  { %1005 = vmatpush3.bf16.msra.mxu0 %v1142_v25  ;;  %v1184_v16 = vld [vmem:[#allocation5 + $0x180] sm:$0xff]   ;;  %v97_v19 = vcombine.high %v89_v17, %v89_v17  ;;  %v96_v20 = vrot.slane %v82_v18, %v1331_v35  ;;  %v111_v21 = vpack.c.bf16 %v89_v17, %v89_v17 }
  0x3d   :  { %1027 = vmatpush3.bf16.msra.mxu1 %v1143_v26  ;;  %1006 = vmatprep.subr.bf16.mxu0 %v1144_v27  ;;  %v1186_v26 = vld [vmem:[#allocation7 + $0x38] sm:$0xff]   ;;  %v1286_v27 = vmov 0.0   ;;  %v1193_v35 = vld [vmem:[#allocation7] sm:$0xff]  }
  0x3e   :  { %1028 = vmatprep.subr.bf16.mxu1 %v1145_v28  ;;  %v112_v22 = vpack.c.bf16 %v97_v19, %v97_v19  ;;  %v98_v23 = vcombine.high %v96_v20, %v96_v20  ;;  %v113_v24 = vpack.c.bf16 %v96_v20, %v96_v20  ;;  %v1187_v28 = vld [vmem:[#allocation7 + $0x30] sm:$0xff]  }
  0x40   :  { %1007 = vmatpush3.bf16.msra.mxu0 %v1146_v31  ;;  %v114_v25 = vpack.c.bf16 %v98_v23, %v98_v23  ;;  %v1189_v31 = vld [vmem:[#allocation7 + $0x20] sm:$0xff]  }
  0x41   :  { %1029 = vmatpush3.bf16.msra.mxu1 %v1147_v32  ;;  %1008 = vmatprep.subr.bf16.mxu0 %v1148_v33  ;;  %v1190_v32 = vld [vmem:[#allocation7 + $0x18] sm:$0xff]   ;;  %v1191_v33 = vld [vmem:[#allocation7 + $0x10] sm:$0xff]  }
  0x42   :  { %1030 = vmatprep.subr.bf16.mxu1 %v1149_v34  ;;  %v1192_v34 = vld [vmem:[#allocation7 + $0x8] sm:$0xff]  }
  0x44   :  { %1009 = vmatpush3.bf16.msra.mxu0 %v1150_v36 }
  0x45   :  { %1031 = vmatpush3.bf16.msra.mxu1 %v1151_v37  ;;  %1038 = vmatprep.subr.bf16.mxu0 %v1153_v41 }
  0x46   :  { %1060 = vmatprep.subr.bf16.mxu1 %v1154_v42 }
  0x47   :  { %666 = vmatmul.mubr.bf16.vlgmr.msra.gmra.mxu0 %v107_v45  ;;  %v244_v45 = vunpack.c.l.bf16 %v243_v44 }
  0x48   :  { %1039 = vmatpush3.bf16.msra.mxu0 %v1155_v46  ;;  %706 = vmatmul.mubr.bf16.vlgmr.msra.gmra.mxu1 %v109_v50  ;;  %v247_v46 = vsub.s32 0, %v1328_v30  ;;  %v811_v30 = vld [vmem:[%s1351_s4] sm:$0x1] }
  0x49   :  { %1040 = vmatprep.subr.bf16.mxu0 %v1157_v51  ;;  %1061 = vmatpush3.bf16.msra.mxu1 %v1156_v49 }
  0x4a   :  { %1062 = vmatprep.subr.bf16.mxu1 %v1158_v53  ;;  %745 = vmatprep.mubr.bf16.mxu0 %v112_v22  ;;  %v248_v47 = vrot.slane %v244_v45, %v247_v46 }
  0x4b   :  { %785 = vmatprep.mubr.bf16.mxu1 %v114_v25 }
  0x4c   :  { %1041 = vmatpush3.bf16.msra.mxu0 %v1159_v54 }
  0x4d   :  { %1042 = vmatprep.subr.bf16.mxu0 %v1161_v56  ;;  %1063 = vmatpush3.bf16.msra.mxu1 %v1160_v55 }
  0x4e   :  { %1064 = vmatprep.subr.bf16.mxu1 %v1162_v57 }
  0x50   :  { %1043 = vmatpush3.bf16.msra.mxu0 %v1163_v58 }
  0x51   :  { %1044 = vmatprep.subr.bf16.mxu0 %v1165_v60  ;;  %1065 = vmatpush3.bf16.msra.mxu1 %v1164_v59 }
  0x52   :  { %1066 = vmatprep.subr.bf16.mxu1 %v1166_v61 }
  0x54   :  { %1045 = vmatpush3.bf16.msra.mxu0 %v1167_v62 }
  0x55   :  { %1046 = vmatprep.subr.bf16.mxu0 %v1169_v0  ;;  %1067 = vmatpush3.bf16.msra.mxu1 %v1168_v63 }
  0x56   :  { %1068 = vmatprep.subr.bf16.mxu1 %v1170_v1 }
  0x58   :  { %1047 = vmatpush3.bf16.msra.mxu0 %v1171_v2  ;;  %v812_v2 = vunpack.c.l.bf16 %v811_v30 }
  0x59   :  { %1048 = vmatprep.subr.bf16.mxu0 %v1173_v4  ;;  %1069 = vmatpush3.bf16.msra.mxu1 %v1172_v3 }
  0x5a   :  { %1070 = vmatprep.subr.bf16.mxu1 %v1174_v5  ;;  %v816_v3 = vrot.slane %v812_v2, %v247_v46 }
  0x5c   :  { %1049 = vmatpush3.bf16.msra.mxu0 %v1175_v6 }
  0x5d   :  { %1050 = vmatprep.subr.bf16.mxu0 %v1177_v8  ;;  %1071 = vmatpush3.bf16.msra.mxu1 %v1176_v7 }
  0x5e   :  { %1072 = vmatprep.subr.bf16.mxu1 %v1178_v9 }
  0x60   :  { %1051 = vmatpush3.bf16.msra.mxu0 %v1179_v10 }
  0x61   :  { %1052 = vmatprep.subr.bf16.mxu0 %v1181_v12  ;;  %1073 = vmatpush3.bf16.msra.mxu1 %v1180_v11 }
  0x62   :  { %1074 = vmatprep.subr.bf16.mxu1 %v1182_v13 }
  0x64   :  { %1053 = vmatpush3.bf16.msra.mxu0 %v1183_v14 }
  0x65   :  { %1075 = vmatpush3.bf16.msra.mxu1 %v1184_v16  ;;  %1091 = vmatprep.subr.bf16.mxu0 %v1286_v27 }
  0x67   :  { %746 = vmatmul.mubr.bf16.vlgmr.msra.gmra.mxu0 %v111_v21 }
  0x68   :  { %786 = vmatmul.mubr.bf16.vlgmr.msra.gmra.mxu1 %v113_v24  ;;  %1092 = vmatpush3.bf16.msra.mxu0 %v1186_v26 }
  0x69   :  { %1093 = vmatprep.subr.bf16.mxu0 %v1286_v27  ;;  %1107 = vmatprep.mubr.msk.bf16.mxu0 %vm1287_vm0, %v1286_v27 }
  0x6c   :  { %1094 = vmatpush3.bf16.msra.mxu0 %v1187_v28 }
  0x6d   :  { %1095 = vmatprep.subr.bf16.mxu0 %v1286_v27 }
  0x70   :  { %1096 = vmatpush3.bf16.msra.mxu0 %v1188_v29 }
  0x71   :  { %1097 = vmatprep.subr.bf16.mxu0 %v1286_v27 }
  0x74   :  { %1098 = vmatpush3.bf16.msra.mxu0 %v1189_v31 }
  0x75   :  { %1099 = vmatprep.subr.bf16.mxu0 %v1286_v27 }
  0x78   :  { %1100 = vmatpush3.bf16.msra.mxu0 %v1190_v32 }
  0x79   :  { %1101 = vmatprep.subr.bf16.mxu0 %v1286_v27 }
  0x7c   :  { %1102 = vmatpush3.bf16.msra.mxu0 %v1191_v33 }
  0x7d   :  { %1103 = vmatprep.subr.bf16.mxu0 %v1286_v27 }
  0x80   :  { %1104 = vmatpush3.bf16.msra.mxu0 %v1192_v34 }
  0x81   :  { %1105 = vmatprep.subr.bf16.mxu0 %v1286_v27 }
  0x84   :  { %1106 = vmatpush3.bf16.msra.mxu0 %v1193_v35 }
 0x107   :  { %v1010_v36 = vpop.f32.mrf.mxu0 }
 0x108   :  { %v1032_v37 = vpop.f32.mrf.mxu1 }
 0x109   :  { %v1011_v38 = vpop.f32.mrf.mxu0 }
 0x10a   :  { %v1033_v39 = vpop.f32.mrf.mxu1  ;;  %v1012_v48 = vadd.f32 %v1011_v38, %v1010_v36 }
 0x10b   :  { %v1013_v40 = vpop.f32.mrf.mxu0  ;;  %v1034_v50 = vadd.f32 %v1033_v39, %v1032_v37 }
 0x10c   :  { %v1035_v41 = vpop.f32.mrf.mxu1  ;;  %v668_v49 = vadd.f32 %v1012_v48, %v248_v47 }
 0x10d   :  { %v1014_v42 = vpop.f32.mrf.mxu0 }
 0x10e   :  { %v1036_v43 = vpop.f32.mrf.mxu1  ;;  %v708_v54 = vadd.f32 %v1034_v50, %v668_v49 }
 0x127   :  { %v1054_v51 = vpop.f32.mrf.mxu0 }
 0x128   :  { %v1076_v52 = vpop.f32.mrf.mxu1 }
 0x129   :  { %v1055_v53 = vpop.f32.mrf.mxu0 }
 0x12a   :  { %v1056_v55 = vadd.f32 %v1055_v53, %v1054_v51  ;;  %v1077_v56 = vpop.f32.mrf.mxu1 }
 0x12b   :  { %v1057_v57 = vpop.f32.mrf.mxu0  ;;  %v1078_v59 = vadd.f32 %v1077_v56, %v1076_v52 }
 0x12c   :  { %v748_v58 = vadd.f32 %v1056_v55, %v708_v54  ;;  %v1079_v60 = vpop.f32.mrf.mxu1 }
 0x12d   :  { %v1058_v61 = vpop.f32.mrf.mxu0 }
 0x12e   :  { %v788_v62 = vadd.f32 %v1078_v59, %v748_v58  ;;  %v1080_v63 = vpop.f32.mrf.mxu1 }
 0x130   :  { %v793_v0 = vmax.f32 %v788_v62, 0.0 }
 0x132   :  { %v794_v1 = vpack.c.bf16 %v793_v0, %v793_v0 }
 0x134   :  { %1108 = vmatmul.mubr.bf16.vlgmr.msra.gmra.mxu0 %v794_v1 }
 0x1f4   :  { %v899_v4 = vpop.f32.mrf.mxu0 }
 0x1f5   :  { %v900_v5 = vadd.f32 %v899_v4, %v816_v3 }
 0x1f6   :  { %v1109_v6 = vpop.f32.mrf.mxu0 }
 0x1f7   :  { %905 = vst [vmem:[#allocation8] sm:$0x3] %v900_v5 }
 0x1f8   :  { %v902_v7 = vpop.f32.mrf.mxu0 }
 0x1f9   :  { %1265 = shalt.err (!%p1262_p5)
}
 0x1fa   :  { %915 = dma.vmem_to_hbm [thread:$0]  %s913_s11, 32, %s1352_s5, [#allocation4]   ;;  %v1110_v8 = vpop.f32.mrf.mxu0 }
 0x1fb   :  { %1278 = dma.done.wait [#allocation4], 32  }
 0x1fc   :  { %1279 = vsyncadd [#allocation4], 4294967264 }
 0x1fd   :  { %919 = vsyncpa [#allocation3], 1 }
 0x1fe   :  { %920 = vsyncpa [#allocation6], 1 }
 0x1ff   :  { %921 = vsyncpa [#allocation4], 1 }

</bundles_post_ra>
